<compile_context>
chip_gen: v5e
topology: v5e:2x2
jax: 0.10.0
libtpu: 0.0.40
codegen_flags: <defaults>
</compile_context>

<pallas_src>
import functools

import jax
import jax.numpy as jnp
from jax.experimental import pallas as pl
from jax.experimental.pallas import tpu as pltpu

EPS = 1e-5  # nn.InstanceNorm2d default eps


def _round_up(v, m):
    return -(-v // m) * m


def _conv_block_kernel(x_ref, w_ref, m_ref, o_ref, *, offsets, hw_true, l_pad):
    # x_ref: (Nb, Cin, Li_pad)   zero-padded, flattened input (bf16)
    # w_ref: (K*K, Cout, Cin)    per-tap conv weights (bf16)
    # m_ref: (1, L_pad)          1.0 for valid output columns, 0.0 for pad/junk
    # o_ref: (Nb, Cout, L_pad)   normalized + activated output (bf16)
    nb = x_ref.shape[0]
    c_out = o_ref.shape[1]

    mask = m_ref[...]                                   # (1, L_pad) f32
    w_all = w_ref[...]                                  # (K*K, Cout, Cin)
    w_taps = [w_all[t] for t in range(w_all.shape[0])]  # loop-invariant hoist
    inv_hw = 1.0 / float(hw_true)

    def sample_body(n, carry):
        x_n = x_ref[n]                                  # (Cin, Li_pad)
        acc = jnp.zeros((c_out, l_pad), jnp.float32)
        # K*K-tap conv as accumulated MXU matmuls over the width-extended grid.
        for t, off in enumerate(offsets):               # static K*K loop
            win = x_n[:, off:off + l_pad]               # (Cin, L_pad) shifted window
            acc = acc + jnp.dot(w_taps[t], win,
                                preferred_element_type=jnp.float32)

        # InstanceNorm2d(affine=False): one-pass stats, pad/junk columns excluded.
        ym = acc * mask
        s1 = jnp.sum(ym, axis=1, keepdims=True)         # (Cout, 1)
        s2 = jnp.sum(ym * ym, axis=1, keepdims=True)    # (Cout, 1)
        mean = s1 * inv_hw
        var = s2 * inv_hw - mean * mean                 # biased variance
        y = (ym - mean) * jax.lax.rsqrt(var + EPS)

        # ReLU; lane-dense (L_pad % 128 == 0) unmasked bf16 store.
        o_ref[n] = jnp.maximum(y, 0.0).astype(o_ref.dtype)
        return carry

    jax.lax.fori_loop(0, nb, sample_body, 0, unroll=(nb <= 4))


def _vmem_budget_and_limit():
    """Generation-aware VMEM sizing (128 MiB on v5e/v6e, 64 MiB per TC on v7x)."""
    try:
        cap = int(pltpu.get_tpu_info().vmem_capacity_bytes)
    except Exception:
        cap = 64 << 20
    budget = max(8 << 20, min((3 * cap) // 8, 48 << 20))    # tile-picking budget
    limit = max(32 << 20, min(cap - (16 << 20), 96 << 20))  # scoped VMEM limit
    return budget, limit


def _pick_block_n(n, c_in, li_pad, c_out, kk, l_pad, in_bytes, out_bytes,
                  budget_bytes):
    """Largest divisor of n (capped at n//2 so the 'parallel' grid axis has at
    least 2 steps for v7x megacore) whose double-buffered, padded tiles fit."""
    cin_p = _round_up(c_in, 8)
    cout_p = _round_up(c_out, 8)
    w_cost = 2 * kk * cout_p * _round_up(c_in, 128) * in_bytes   # weight dbl buf
    m_cost = 2 * 8 * l_pad * 4                                    # mask dbl buf
    best = 1
    for nb in range(1, max(1, n // 2) + 1):
        if n % nb:
            continue
        cost = (2 * nb * cin_p * li_pad * in_bytes      # input tiles
                + 2 * nb * cout_p * l_pad * out_bytes   # output tiles
                + w_cost + m_cost)
        if cost <= budget_bytes:
            best = nb
    return best


def conv_block_forward(x_nchw, weight, bias, *, padding,
                       compute_dtype=jnp.bfloat16, out_dtype=jnp.bfloat16):
    """Forward pass of conv_block with norm='in', activation='relu',
    pad_type='zero', stride=1, dilation=1, groups=1."""
    del bias  # cancelled exactly by InstanceNorm2d(affine=False) mean subtraction

    N, C_in, H, W = x_nchw.shape
    C_out, _, K, K2 = weight.shape
    assert K == K2
    Hp, Wp = H + 2 * padding, W + 2 * padding
    Ho, Wo = Hp - K + 1, Wp - K + 1
    HW = Ho * Wo                               # true spatial size for the norm

    L = Ho * Wp                                # width-extended output length
    L_pad = _round_up(L, 128)                  # lane-dense store width
    max_off = (K - 1) * Wp + (K - 1)
    Li_pad = _round_up(max_off + L_pad, 128)   # flattened/padded input length

    # --- glue: zero pad + flatten (single cheap XLA copy, ~1x input bytes) ---
    # TODO(synk): the spatial zero-pad + flatten could also be folded into the
    # kernel (read raw NCHW + mask the borders) to drop this one wrapper copy.
    xp = jnp.pad(x_nchw, ((0, 0), (0, 0), (padding, padding), (padding, padding)))
    xf = xp.reshape(N, C_in, Hp * Wp)
    xf = jnp.pad(xf, ((0, 0), (0, 0), (0, Li_pad - Hp * Wp))).astype(compute_dtype)

    # Weights as per-tap (Cout, Cin) matrices; tap order t = ki*K + kj matches
    # the lane offsets below.
    w_taps = jnp.transpose(weight, (2, 3, 0, 1)).reshape(K * K, C_out, C_in)
    w_taps = w_taps.astype(compute_dtype)
    offsets = tuple(ki * Wp + kj for ki in range(K) for kj in range(K))

    # Valid-column mask on the extended grid: l = h*Wp + w', valid iff w' < Wo.
    l_idx = jnp.arange(L_pad, dtype=jnp.int32)
    mask = (((l_idx % Wp) < Wo) & (l_idx < L)).astype(jnp.float32).reshape(1, L_pad)

    in_bytes = jnp.dtype(compute_dtype).itemsize
    out_bytes = jnp.dtype(out_dtype).itemsize
    budget, vmem_limit = _vmem_budget_and_limit()
    block_n = _pick_block_n(N, C_in, Li_pad, C_out, K * K, L_pad,
                            in_bytes, out_bytes, budget)
    grid = (N // block_n,)

    kernel = functools.partial(_conv_block_kernel, offsets=offsets,
                               hw_true=HW, l_pad=L_pad)

    cost = pl.CostEstimate(
        flops=2 * N * (K * K) * C_out * C_in * L_pad,
        transcendentals=N * C_out,
        bytes_accessed=(xf.size * in_bytes + w_taps.size * in_bytes
                        + mask.size * 4 + N * C_out * L_pad * out_bytes),
    )

    out = pl.pallas_call(
        kernel,
        out_shape=jax.ShapeDtypeStruct((N, C_out, L_pad), out_dtype),
        grid_spec=pltpu.PrefetchScalarGridSpec(
            num_scalar_prefetch=0,
            grid=grid,
            in_specs=[
                pl.BlockSpec((block_n, C_in, Li_pad), lambda i: (i, 0, 0)),
                pl.BlockSpec((K * K, C_out, C_in), lambda i: (0, 0, 0)),
                pl.BlockSpec((1, L_pad), lambda i: (0, 0)),
            ],
            out_specs=pl.BlockSpec((block_n, C_out, L_pad), lambda i: (i, 0, 0)),
        ),
        compiler_params=pltpu.CompilerParams(
            dimension_semantics=("parallel",),
            vmem_limit_bytes=vmem_limit,
        ),
        cost_estimate=cost,
    )(xf, w_taps, mask)

    # Drop the width-extension / lane-pad columns; reshape to NCHW.
    out = out[:, :, :L].reshape(N, C_out, Ho, Wp)[:, :, :, :Wo]
    return out


def _reference(x_nchw, weight, bias, *, padding):
    """Pure-JAX f32 reference (conv + bias + instance norm + relu)."""
    y = jax.lax.conv_general_dilated(
        x_nchw, weight, window_strides=(1, 1),
        padding=[(padding, padding), (padding, padding)],
        dimension_numbers=("NCHW", "OIHW", "NCHW"),
        precision=jax.lax.Precision.HIGHEST)
    y = y + bias.reshape(1, -1, 1, 1)
    mean = jnp.mean(y, axis=(2, 3), keepdims=True)
    var = jnp.mean((y - mean) ** 2, axis=(2, 3), keepdims=True)
    y = (y - mean) * jax.lax.rsqrt(var + EPS)
    return jnp.maximum(y, 0.0)


if __name__ == "__main__":
    key = jax.random.PRNGKey(0)
    k_x, k_w, k_b = jax.random.split(key, 3)

    # conv_block(4, 8, 3, padding=1, norm='in', activation='relu', pad_type='zero')
    N, C_in, C_out, K, H, W, pad = 2, 4, 8, 3, 16, 16, 1

    x = jax.random.normal(k_x, (N, C_in, H, W), dtype=jnp.float32)
    fan_in = C_in * K * K
    weight = jax.random.normal(k_w, (C_out, C_in, K, K), dtype=jnp.float32) / jnp.sqrt(fan_in)
    bias = jax.random.normal(k_b, (C_out,), dtype=jnp.float32) * 0.1

    fwd = jax.jit(functools.partial(conv_block_forward, padding=pad))
    out = jax.block_until_ready(fwd(x, weight, bias))

    # Apples-to-apples reference: the kernel consumes bf16-rounded inputs and
    # stores bf16, so round the reference inputs the same way and compare with
    # bf16-level tolerance (the reference keeps the bias to prove it cancels).
    x_r = x.astype(jnp.bfloat16).astype(jnp.float32)
    w_r = weight.astype(jnp.bfloat16).astype(jnp.float32)
    ref = _reference(x_r, w_r, bias, padding=pad)

    assert out.shape == (N, C_out, H, W)
    assert jnp.allclose(out.astype(jnp.float32), ref, atol=3e-2, rtol=3e-2), \
        "mismatch vs reference"

    print("KERNEL_OK")
</pallas_src>

<mosaic_0001>
module attributes {stable_mosaic.version = 11 : i64} {
  func.func @_conv_block_kernel(%arg0: i32, %arg1: memref<1x4x512xbf16, #tpu.memory_space<vmem>>, %arg2: memref<9x8x4xbf16, #tpu.memory_space<vmem>>, %arg3: memref<1x384xf32, #tpu.memory_space<vmem>>, %arg4: memref<1x8x384xbf16, #tpu.memory_space<vmem>>) attributes {dimension_semantics = [#tpu.dimension_semantics<parallel>], iteration_bounds = array<i64: 2>, scalar_prefetch = 0 : i64, scratch_operands = 0 : i64, tpu.core_type = #tpu.core_type<tc>, window_params = [{transform_indices = @transform_0, window_bounds = array<i64: 1, 4, 512>}, {pipeline_mode = #tpu.pipeline_mode<synchronous>, transform_indices = @transform_1, window_bounds = array<i64: 9, 8, 4>}, {pipeline_mode = #tpu.pipeline_mode<synchronous>, transform_indices = @transform_2, window_bounds = array<i64: 1, 384>}, {transform_indices = @transform_3, window_bounds = array<i64: 1, 8, 384>}]} {
    %c0 = arith.constant 0 : index
    %c0_0 = arith.constant 0 : index
    %0 = vector.load %arg3[%c0, %c0_0] : memref<1x384xf32, #tpu.memory_space<vmem>>, vector<1x384xf32>
    %c0_1 = arith.constant 0 : index
    %c0_2 = arith.constant 0 : index
    %c0_3 = arith.constant 0 : index
    %1 = vector.load %arg2[%c0_1, %c0_2, %c0_3] : memref<9x8x4xbf16, #tpu.memory_space<vmem>>, vector<9x8x4xbf16>
    %2 = vector.extract_strided_slice %1 {offsets = [0, 0, 0], sizes = [1, 8, 4], strides = [1, 1, 1]} : vector<9x8x4xbf16> to vector<1x8x4xbf16>
    %3 = vector.shape_cast %2 : vector<1x8x4xbf16> to vector<8x4xbf16>
    %4 = vector.extract_strided_slice %1 {offsets = [1, 0, 0], sizes = [1, 8, 4], strides = [1, 1, 1]} : vector<9x8x4xbf16> to vector<1x8x4xbf16>
    %5 = vector.shape_cast %4 : vector<1x8x4xbf16> to vector<8x4xbf16>
    %6 = vector.extract_strided_slice %1 {offsets = [2, 0, 0], sizes = [1, 8, 4], strides = [1, 1, 1]} : vector<9x8x4xbf16> to vector<1x8x4xbf16>
    %7 = vector.shape_cast %6 : vector<1x8x4xbf16> to vector<8x4xbf16>
    %8 = vector.extract_strided_slice %1 {offsets = [3, 0, 0], sizes = [1, 8, 4], strides = [1, 1, 1]} : vector<9x8x4xbf16> to vector<1x8x4xbf16>
    %9 = vector.shape_cast %8 : vector<1x8x4xbf16> to vector<8x4xbf16>
    %10 = vector.extract_strided_slice %1 {offsets = [4, 0, 0], sizes = [1, 8, 4], strides = [1, 1, 1]} : vector<9x8x4xbf16> to vector<1x8x4xbf16>
    %11 = vector.shape_cast %10 : vector<1x8x4xbf16> to vector<8x4xbf16>
    %12 = vector.extract_strided_slice %1 {offsets = [5, 0, 0], sizes = [1, 8, 4], strides = [1, 1, 1]} : vector<9x8x4xbf16> to vector<1x8x4xbf16>
    %13 = vector.shape_cast %12 : vector<1x8x4xbf16> to vector<8x4xbf16>
    %14 = vector.extract_strided_slice %1 {offsets = [6, 0, 0], sizes = [1, 8, 4], strides = [1, 1, 1]} : vector<9x8x4xbf16> to vector<1x8x4xbf16>
    %15 = vector.shape_cast %14 : vector<1x8x4xbf16> to vector<8x4xbf16>
    %16 = vector.extract_strided_slice %1 {offsets = [7, 0, 0], sizes = [1, 8, 4], strides = [1, 1, 1]} : vector<9x8x4xbf16> to vector<1x8x4xbf16>
    %17 = vector.shape_cast %16 : vector<1x8x4xbf16> to vector<8x4xbf16>
    %18 = vector.extract_strided_slice %1 {offsets = [8, 0, 0], sizes = [1, 8, 4], strides = [1, 1, 1]} : vector<9x8x4xbf16> to vector<1x8x4xbf16>
    %19 = vector.shape_cast %18 : vector<1x8x4xbf16> to vector<8x4xbf16>
    %c0_i32 = arith.constant 0 : i32
    %20 = arith.index_cast %c0_i32 : i32 to index
    %c0_4 = arith.constant 0 : index
    %c0_5 = arith.constant 0 : index
    %21 = vector.load %arg1[%20, %c0_4, %c0_5] : memref<1x4x512xbf16, #tpu.memory_space<vmem>>, vector<1x4x512xbf16>
    %22 = vector.shape_cast %21 : vector<1x4x512xbf16> to vector<4x512xbf16>
    %cst = arith.constant 0.000000e+00 : f32
    %23 = vector.broadcast %cst : f32 to vector<8x384xf32>
    %24 = vector.extract_strided_slice %22 {offsets = [0, 0], sizes = [4, 384], strides = [1, 1]} : vector<4x512xbf16> to vector<4x384xbf16>
    %cst_6 = arith.constant dense<0.000000e+00> : vector<8x384xf32>
    %25 = tpu.matmul %3, %24, %cst_6 {dimension_numbers = #tpu.dot_dimension_numbers<[1], [0], [0], [1], [0, 0, 1, 1], [], []>} : vector<8x4xbf16>, vector<4x384xbf16>, vector<8x384xf32> -> vector<8x384xf32>
    %26 = arith.addf %23, %25 : vector<8x384xf32>
    %27 = vector.extract_strided_slice %22 {offsets = [0, 1], sizes = [4, 384], strides = [1, 1]} : vector<4x512xbf16> to vector<4x384xbf16>
    %cst_7 = arith.constant dense<0.000000e+00> : vector<8x384xf32>
    %28 = tpu.matmul %5, %27, %cst_7 {dimension_numbers = #tpu.dot_dimension_numbers<[1], [0], [0], [1], [0, 0, 1, 1], [], []>} : vector<8x4xbf16>, vector<4x384xbf16>, vector<8x384xf32> -> vector<8x384xf32>
    %29 = arith.addf %26, %28 : vector<8x384xf32>
    %30 = vector.extract_strided_slice %22 {offsets = [0, 2], sizes = [4, 384], strides = [1, 1]} : vector<4x512xbf16> to vector<4x384xbf16>
    %cst_8 = arith.constant dense<0.000000e+00> : vector<8x384xf32>
    %31 = tpu.matmul %7, %30, %cst_8 {dimension_numbers = #tpu.dot_dimension_numbers<[1], [0], [0], [1], [0, 0, 1, 1], [], []>} : vector<8x4xbf16>, vector<4x384xbf16>, vector<8x384xf32> -> vector<8x384xf32>
    %32 = arith.addf %29, %31 : vector<8x384xf32>
    %33 = vector.extract_strided_slice %22 {offsets = [0, 18], sizes = [4, 384], strides = [1, 1]} : vector<4x512xbf16> to vector<4x384xbf16>
    %cst_9 = arith.constant dense<0.000000e+00> : vector<8x384xf32>
    %34 = tpu.matmul %9, %33, %cst_9 {dimension_numbers = #tpu.dot_dimension_numbers<[1], [0], [0], [1], [0, 0, 1, 1], [], []>} : vector<8x4xbf16>, vector<4x384xbf16>, vector<8x384xf32> -> vector<8x384xf32>
    %35 = arith.addf %32, %34 : vector<8x384xf32>
    %36 = vector.extract_strided_slice %22 {offsets = [0, 19], sizes = [4, 384], strides = [1, 1]} : vector<4x512xbf16> to vector<4x384xbf16>
    %cst_10 = arith.constant dense<0.000000e+00> : vector<8x384xf32>
    %37 = tpu.matmul %11, %36, %cst_10 {dimension_numbers = #tpu.dot_dimension_numbers<[1], [0], [0], [1], [0, 0, 1, 1], [], []>} : vector<8x4xbf16>, vector<4x384xbf16>, vector<8x384xf32> -> vector<8x384xf32>
    %38 = arith.addf %35, %37 : vector<8x384xf32>
    %39 = vector.extract_strided_slice %22 {offsets = [0, 20], sizes = [4, 384], strides = [1, 1]} : vector<4x512xbf16> to vector<4x384xbf16>
    %cst_11 = arith.constant dense<0.000000e+00> : vector<8x384xf32>
    %40 = tpu.matmul %13, %39, %cst_11 {dimension_numbers = #tpu.dot_dimension_numbers<[1], [0], [0], [1], [0, 0, 1, 1], [], []>} : vector<8x4xbf16>, vector<4x384xbf16>, vector<8x384xf32> -> vector<8x384xf32>
    %41 = arith.addf %38, %40 : vector<8x384xf32>
    %42 = vector.extract_strided_slice %22 {offsets = [0, 36], sizes = [4, 384], strides = [1, 1]} : vector<4x512xbf16> to vector<4x384xbf16>
    %cst_12 = arith.constant dense<0.000000e+00> : vector<8x384xf32>
    %43 = tpu.matmul %15, %42, %cst_12 {dimension_numbers = #tpu.dot_dimension_numbers<[1], [0], [0], [1], [0, 0, 1, 1], [], []>} : vector<8x4xbf16>, vector<4x384xbf16>, vector<8x384xf32> -> vector<8x384xf32>
    %44 = arith.addf %41, %43 : vector<8x384xf32>
    %45 = vector.extract_strided_slice %22 {offsets = [0, 37], sizes = [4, 384], strides = [1, 1]} : vector<4x512xbf16> to vector<4x384xbf16>
    %cst_13 = arith.constant dense<0.000000e+00> : vector<8x384xf32>
    %46 = tpu.matmul %17, %45, %cst_13 {dimension_numbers = #tpu.dot_dimension_numbers<[1], [0], [0], [1], [0, 0, 1, 1], [], []>} : vector<8x4xbf16>, vector<4x384xbf16>, vector<8x384xf32> -> vector<8x384xf32>
    %47 = arith.addf %44, %46 : vector<8x384xf32>
    %48 = vector.extract_strided_slice %22 {offsets = [0, 38], sizes = [4, 384], strides = [1, 1]} : vector<4x512xbf16> to vector<4x384xbf16>
    %cst_14 = arith.constant dense<0.000000e+00> : vector<8x384xf32>
    %49 = tpu.matmul %19, %48, %cst_14 {dimension_numbers = #tpu.dot_dimension_numbers<[1], [0], [0], [1], [0, 0, 1, 1], [], []>} : vector<8x4xbf16>, vector<4x384xbf16>, vector<8x384xf32> -> vector<8x384xf32>
    %50 = arith.addf %47, %49 : vector<8x384xf32>
    %51 = vector.broadcast %0 : vector<1x384xf32> to vector<8x384xf32>
    %52 = arith.mulf %50, %51 : vector<8x384xf32>
    %cst_15 = arith.constant dense<0.000000e+00> : vector<8xf32>
    %53 = vector.multi_reduction <add>, %52, %cst_15 [1] : vector<8x384xf32> to vector<8xf32>
    %54 = vector.shape_cast %53 : vector<8xf32> to vector<8x1xf32>
    %55 = arith.mulf %52, %52 : vector<8x384xf32>
    %cst_16 = arith.constant dense<0.000000e+00> : vector<8xf32>
    %56 = vector.multi_reduction <add>, %55, %cst_16 [1] : vector<8x384xf32> to vector<8xf32>
    %57 = vector.shape_cast %56 : vector<8xf32> to vector<8x1xf32>
    %cst_17 = arith.constant 3.906250e-03 : f32
    %58 = vector.broadcast %cst_17 : f32 to vector<8x1xf32>
    %59 = arith.mulf %54, %58 : vector<8x1xf32>
    %cst_18 = arith.constant 3.906250e-03 : f32
    %60 = vector.broadcast %cst_18 : f32 to vector<8x1xf32>
    %61 = arith.mulf %57, %60 : vector<8x1xf32>
    %62 = arith.mulf %59, %59 : vector<8x1xf32>
    %63 = arith.subf %61, %62 : vector<8x1xf32>
    %64 = vector.broadcast %59 : vector<8x1xf32> to vector<8x384xf32>
    %65 = arith.subf %52, %64 : vector<8x384xf32>
    %cst_19 = arith.constant 9.99999974E-6 : f32
    %66 = vector.broadcast %cst_19 : f32 to vector<8x1xf32>
    %67 = arith.addf %63, %66 : vector<8x1xf32>
    %68 = math.rsqrt %67 : vector<8x1xf32>
    %69 = vector.broadcast %68 : vector<8x1xf32> to vector<8x384xf32>
    %70 = arith.mulf %65, %69 : vector<8x384xf32>
    %cst_20 = arith.constant 0.000000e+00 : f32
    %71 = vector.broadcast %cst_20 : f32 to vector<8x384xf32>
    %72 = arith.maximumf %70, %71 : vector<8x384xf32>
    %73 = arith.truncf %72 : vector<8x384xf32> to vector<8x384xbf16>
    %74 = arith.index_cast %c0_i32 : i32 to index
    %c0_21 = arith.constant 0 : index
    %c0_22 = arith.constant 0 : index
    %75 = vector.load %arg4[%74, %c0_21, %c0_22] : memref<1x8x384xbf16, #tpu.memory_space<vmem>>, vector<1x8x384xbf16>
    %76 = vector.shape_cast %75 : vector<1x8x384xbf16> to vector<8x384xbf16>
    %77 = vector.shape_cast %73 : vector<8x384xbf16> to vector<1x8x384xbf16>
    tpu.vector_store %arg4[%74, %c0_21, %c0_22], %77 {strides = array<i32>} : memref<1x8x384xbf16, #tpu.memory_space<vmem>>, vector<1x8x384xbf16>,
    %c1_i32 = arith.constant 1 : i32
    return
  }
  func.func @transform_0(%arg0: i32) -> (i32, i32, i32) {
    %c0_i32 = arith.constant 0 : i32
    %c0_i32_0 = arith.constant 0 : i32
    %c0_i32_1 = arith.constant 0 : i32
    return %arg0, %c0_i32, %c0_i32_0 : i32, i32, i32
  }
  func.func @transform_1(%arg0: i32) -> (i32, i32, i32) {
    %c0_i32 = arith.constant 0 : i32
    %c0_i32_0 = arith.constant 0 : i32
    %c0_i32_1 = arith.constant 0 : i32
    %c0_i32_2 = arith.constant 0 : i32
    return %c0_i32, %c0_i32_0, %c0_i32_1 : i32, i32, i32
  }
  func.func @transform_2(%arg0: i32) -> (i32, i32) {
    %c0_i32 = arith.constant 0 : i32
    %c0_i32_0 = arith.constant 0 : i32
    %c0_i32_1 = arith.constant 0 : i32
    return %c0_i32, %c0_i32_0 : i32, i32
  }
  func.func @transform_3(%arg0: i32) -> (i32, i32, i32) {
    %c0_i32 = arith.constant 0 : i32
    %c0_i32_0 = arith.constant 0 : i32
    %c0_i32_1 = arith.constant 0 : i32
    return %arg0, %c0_i32, %c0_i32_0 : i32, i32, i32
  }
}

</mosaic_0001>

<bundles_post_ra>
// kernel: conv_block_forward.1
= control target key start
LH: loop header
LB: loop body
LE: loop exit
PB: predicated region body
PF: predicated region fallthrough
CT: control target
= control target key end

     0   :  { %s1032_s12 = smov 0   ;;  %s1172_s0 = inlined_call_operand.vmem [shape: bf16[2,4,512], index: 0, kind: input, shape index: {}]   ;;  %s1173_s1 = inlined_call_operand.vmem [shape: bf16[9,8,4], index: 1, kind: input, shape index: {}]   ;;  %s1174_s2 = inlined_call_operand.vmem [shape: f32[1,384], index: 2, kind: input, shape index: {}]   ;;  %s1175_s3 = inlined_call_operand.vmem [shape: bf16[2,8,384], index: 3, kind: output, shape index: {}]  }
   0x1 LB: > { %s939_s13 = sadd.s32 4294967295, %s1002_s12   ;;  %p943_p0 = scmp.ge.s32.totalorder %s1002_s12, 1  ;;  %s1002_s12 = sphi %s1032_s12, %s13_s12  }
   0x2   : > { %p137_p1 = scmp.lt.s32.totalorder %s1002_s12, 3 }
   0x4   : > { %p138_p2 = pnand %p943_p0, %p137_p1 }
   0x5   : > { %p161_p3 = scmp.lt.s32.totalorder (!%p138_p2), %s939_s13, 1  ;;  %s1004_s18 = smov (!%p138_p2), 127  }
   0x6   : > { %141 = sbr.rel (%p138_p2) target bundleno = 538 (0x21a), region = 32  ;;  %s1005_s19 = smov (!%p138_p2), 126  }
   0x7   : > { %s1006_s20 = smov (!%p138_p2), 110   ;;  %s1007_s21 = smov (!%p138_p2), 109  }
   0x8   : > { %s1008_s22 = smov (!%p138_p2), 108   ;;  %s1009_s23 = smov (!%p138_p2), 92  }
   0x9   : > { %s1010_s24 = smov (!%p138_p2), 91   ;;  %s1011_s25 = smov (!%p138_p2), 90  }
   0xb   : > { %s1177_s13 = smov (!%p161_p3, %s939_s13), 1  ;;  %vm209_vm0 = vcmask 1041408   ;;  %v173_v37 = vld [vmem:[%s1173_s1] sm:$0xf]  ;;  %vm205_vm1 = vcmask 31744   ;;  %vm327_vm2 = vcmask 1031168  }
   0xc   : > { %s976_s14 = sshll.u32 %s1177_s13, 3  ;;  %vm201_vm3 = vcmask 1039360   ;;  %v174_v54 = vld [vmem:[%s1173_s1 + $0x4] sm:$0xf]  ;;  %vm402_vm4 = vcmask 900096   ;;  %vm477_vm5 = vcmask 891904  }
   0xd   : > { %s165_s17 = scalar_lea.vmem %s1172_s0, %s976_s14  ;;  %v175_v61 = vld [vmem:[%s1173_s1 + $0x8] sm:$0xf]  ;;  %vm552_vm6 = vcmask 883712   ;;  %vm627_vm7 = vcmask 752640   ;;  %vm702_vm8 = vcmask 744448   ;;  %vm777_vm9 = vcmask 736256  }
   0xe   : > { %v1046_v0 = vld [vmem:[%s165_s17] sm:$0xff] }
   0xf   : > { %184 = vst [vmem:[#allocation1] ss:$4 sm:$0xff] %v1046_v0 }
  0x16   : > { %v189_v1 = vld.sshfl [vmem:[#allocation1 + $0x10] sm:$0xff pattern:$0x73625140]  ;;  %v185_v2 = vld.sshfl [vmem:[#allocation1] sm:$0xff pattern:$0x73625140] }
  0x17   : > { %197 = vrot.lane.b32.xlu0 %v189_v1, %s1004_s18  ;;  %193 = vrot.lane.b32.xlu1 %v185_v2, %s1004_s18  ;;  %v191_v3 = vld.sshfl [vmem:[#allocation1 + $0x18] sm:$0xff pattern:$0x73625140]  ;;  %v187_v4 = vld.sshfl [vmem:[#allocation1 + $0x8] sm:$0xff pattern:$0x73625140] }
  0x18   : > { %258 = vst [vmem:[#allocation1] ss:$4 sm:$0xff] %v1046_v0 }
  0x1f   : > { %199 = vrot.lane.b32.xlu0 %v191_v3, %s1004_s18  ;;  %195 = vrot.lane.b32.xlu1 %v187_v4, %s1004_s18  ;;  %v1050_v5 = vld.sshfl [vmem:[#allocation1] sm:$0xff pattern:$0x73625140]  ;;  %v1052_v6 = vld.sshfl [vmem:[#allocation1 + $0x8] sm:$0xff pattern:$0x73625140] }
  0x20   : > { %v1054_v7 = vld.sshfl [vmem:[#allocation1 + $0x10] sm:$0xff pattern:$0x73625140]  ;;  %v265_v34 = vsel %vm209_vm0, %v1050_v5, 0  ;;  %v267_v45 = vsel %vm209_vm0, %v1052_v6, 0 }
  0x21   : > { %310 = vst [vmem:[#allocation1] ss:$4 sm:$0xff] %v1046_v0  ;;  %278 = vmatpush.bf16.msra.mxu3 %v265_v34  ;;  %v269_v49 = vsel %vm209_vm0, %v1054_v7, 0 }
  0x24   : > { %950 = vmatmul.msk.bf16.vlgmr.msra.gmra.mxu3 %vm205_vm1, %v173_v37 }
  0x28   : > { %v313_v8 = vld.sshfl [vmem:[#allocation1 + $0x8] sm:$0xff pattern:$0x73625140]  ;;  %v315_v9 = vld.sshfl [vmem:[#allocation1 + $0x10] sm:$0xff pattern:$0x73625140] }
  0x29   : > { %323 = vrot.lane.b32.xlu0 %v315_v9, %s1005_s19  ;;  %v311_v10 = vld.sshfl [vmem:[#allocation1] sm:$0xff pattern:$0x73625140]  ;;  %v317_v11 = vld.sshfl [vmem:[#allocation1 + $0x18] sm:$0xff pattern:$0x73625140] }
  0x2a   : > { %319 = vrot.lane.b32.xlu2 %v311_v10, %s1005_s19  ;;  %385 = vst [vmem:[#allocation1] ss:$4 sm:$0xff] %v1046_v0 }
  0x31   : > { %325 = vrot.lane.b32.xlu0 %v317_v11, %s1005_s19  ;;  %v388_v12 = vld.sshfl [vmem:[#allocation1 + $0x8] sm:$0xff pattern:$0x73625140]  ;;  %v390_v13 = vld.sshfl [vmem:[#allocation1 + $0x10] sm:$0xff pattern:$0x73625140] }
  0x32   : > { %v392_v14 = vld.sshfl [vmem:[#allocation1 + $0x18] sm:$0xff pattern:$0x73625140]  ;;  %396 = vrot.lane.b32.xlu1 %v388_v12, %s1006_s20  ;;  %321 = vrot.lane.b32.xlu2 %v313_v8, %s1005_s19  ;;  %v386_v15 = vld.sshfl [vmem:[#allocation1] sm:$0xff pattern:$0x73625140] }
  0x33   : > { %460 = vst [vmem:[#allocation1] ss:$4 sm:$0xff] %v1046_v0  ;;  %v176_v11 = vld [vmem:[%s1173_s1 + $0xc] sm:$0xf] }
  0x3a   : > { %394 = vrot.lane.b32.xlu1 %v386_v15, %s1006_s20  ;;  %v465_v16 = vld.sshfl [vmem:[#allocation1 + $0x10] sm:$0xff pattern:$0x73625140]  ;;  %v461_v17 = vld.sshfl [vmem:[#allocation1] sm:$0xff pattern:$0x73625140]  ;;  %398 = vrot.lane.b32.xlu2 %v390_v13, %s1006_s20 }
  0x3b   : > { %473 = vrot.lane.b32.xlu0 %v465_v16, %s1007_s21  ;;  %v467_v18 = vld.sshfl [vmem:[#allocation1 + $0x18] sm:$0xff pattern:$0x73625140]  ;;  %v463_v19 = vld.sshfl [vmem:[#allocation1 + $0x8] sm:$0xff pattern:$0x73625140] }
  0x3c   : > { %535 = vst [vmem:[#allocation1] ss:$4 sm:$0xff] %v1046_v0 }
  0x42   : > { %475 = vrot.lane.b32.xlu1 %v467_v18, %s1007_s21  ;;  %400 = vrot.lane.b32.xlu2 %v392_v14, %s1006_s20 }
  0x43   : > { %471 = vrot.lane.b32.xlu0 %v463_v19, %s1007_s21  ;;  %v538_v20 = vld.sshfl [vmem:[#allocation1 + $0x8] sm:$0xff pattern:$0x73625140]  ;;  %v540_v21 = vld.sshfl [vmem:[#allocation1 + $0x10] sm:$0xff pattern:$0x73625140] }
  0x44   : > { %v542_v22 = vld.sshfl [vmem:[#allocation1 + $0x18] sm:$0xff pattern:$0x73625140]  ;;  %v536_v23 = vld.sshfl [vmem:[#allocation1] sm:$0xff pattern:$0x73625140] }
  0x45   : > { %610 = vst [vmem:[#allocation1] ss:$4 sm:$0xff] %v1046_v0 }
  0x4a   : > { %544 = vrot.lane.b32.xlu1 %v536_v23, %s1008_s22  ;;  %469 = vrot.lane.b32.xlu2 %v461_v17, %s1007_s21  ;;  %s977_s21 = smul.u32 12, %s1177_s13 }
  0x4c   : > { %v617_v24 = vld.sshfl [vmem:[#allocation1 + $0x18] sm:$0xff pattern:$0x73625140]  ;;  %v611_v25 = vld.sshfl [vmem:[#allocation1] sm:$0xff pattern:$0x73625140] }
  0x4d   : > { %619 = vrot.lane.b32.xlu0 %v611_v25, %s1009_s23  ;;  %v613_v26 = vld.sshfl [vmem:[#allocation1 + $0x8] sm:$0xff pattern:$0x73625140]  ;;  %v615_v27 = vld.sshfl [vmem:[#allocation1 + $0x10] sm:$0xff pattern:$0x73625140] }
  0x4e   : > { %685 = vst [vmem:[#allocation1] ss:$4 sm:$0xff] %v1046_v0 }
  0x52   : > { %621 = vrot.lane.b32.xlu1 %v613_v26, %s1009_s23  ;;  %546 = vrot.lane.b32.xlu2 %v538_v20, %s1008_s22 }
  0x55   : > { %550 = vrot.lane.b32.xlu0 %v542_v22, %s1008_s22  ;;  %v686_v28 = vld.sshfl [vmem:[#allocation1] sm:$0xff pattern:$0x73625140]  ;;  %v688_v29 = vld.sshfl [vmem:[#allocation1 + $0x8] sm:$0xff pattern:$0x73625140] }
  0x56   : > { %v690_v30 = vld.sshfl [vmem:[#allocation1 + $0x10] sm:$0xff pattern:$0x73625140]  ;;  %v692_v31 = vld.sshfl [vmem:[#allocation1 + $0x18] sm:$0xff pattern:$0x73625140] }
  0x57   : > { %760 = vst [vmem:[#allocation1] ss:$4 sm:$0xff] %v1046_v0 }
  0x5a   : > { %623 = vrot.lane.b32.xlu1 %v615_v27, %s1009_s23  ;;  %548 = vrot.lane.b32.xlu2 %v540_v21, %s1008_s22 }
  0x5d   : > { %698 = vrot.lane.b32.xlu0 %v690_v30, %s1010_s24  ;;  %v177_v30 = vld [vmem:[%s1173_s1 + $0x10] sm:$0xf] }
  0x5e   : > { %v765_v32 = vld.sshfl [vmem:[#allocation1 + $0x10] sm:$0xff pattern:$0x73625140]  ;;  %v761_v33 = vld.sshfl [vmem:[#allocation1] sm:$0xff pattern:$0x73625140] }
  0x5f   : > { %v763_v35 = vld.sshfl [vmem:[#allocation1 + $0x8] sm:$0xff pattern:$0x73625140]  ;;  %v767_v36 = vld.sshfl [vmem:[#allocation1 + $0x18] sm:$0xff pattern:$0x73625140] }
  0x62   : > { %625 = vrot.lane.b32.xlu1 %v617_v24, %s1009_s23  ;;  %696 = vrot.lane.b32.xlu2 %v688_v29, %s1010_s24 }
  0x65   : > { %700 = vrot.lane.b32.xlu0 %v692_v31, %s1010_s24 }
  0x6a   : > { %773 = vrot.lane.b32.xlu1 %v765_v32, %s1011_s25  ;;  %694 = vrot.lane.b32.xlu2 %v686_v28, %s1010_s24  ;;  %v178_v28 = vld [vmem:[%s1173_s1 + $0x14] sm:$0xf]  ;;  %s170_s24 = scalar_lea.vmem %s1175_s3, %s977_s21 }
  0x6d   : > { %769 = vrot.lane.b32.xlu0 %v761_v33, %s1011_s25 }
  0x72   : > { %771 = vrot.lane.b32.xlu1 %v763_v35, %s1011_s25  ;;  %775 = vrot.lane.b32.xlu2 %v767_v36, %s1011_s25 }
  0x84   : > { %v320_v38 = vpop.permute.xlu2 %319 }
  0x89   : > { %v198_v39 = vpop.permute.xlu0 %197  ;;  %v194_v40 = vpop.permute.xlu1 %193 }
  0x8c   : > { %v322_v41 = vpop.permute.xlu2 %321 }
  0x8d   : > { %v328_v42 = vsel %vm327_vm2, %v320_v38, %v322_v41 }
  0x8e   : > { %v335_v53 = vsel %vm209_vm0, %v328_v42, 0 }
  0x91   : > { %v200_v43 = vpop.permute.xlu0 %199  ;;  %v196_v44 = vpop.permute.xlu1 %195 }
  0x92   : > { %v202_v46 = vsel %vm201_vm3, %v194_v40, %v196_v44  ;;  %v203_v47 = vsel %vm201_vm3, %v196_v44, %v198_v39  ;;  %v204_v48 = vsel %vm201_vm3, %v198_v39, %v200_v43  ;;  %v179_v43 = vld [vmem:[%s1173_s1 + $0x18] sm:$0xf] }
  0x93   : > { %v211_v50 = vsel %vm209_vm0, %v202_v46, 0  ;;  %v214_v51 = vsel %vm209_vm0, %v203_v47, 0  ;;  %v217_v52 = vsel %vm209_vm0, %v204_v48, 0 }
  0x94   : > { %226 = vmatpush.bf16.msra.mxu0 %v211_v50  ;;  %239 = vmatpush.bf16.msra.mxu1 %v214_v51  ;;  %v399_v55 = vpop.permute.xlu2 %398 }
  0x95   : > { %252 = vmatpush.bf16.msra.mxu2 %v217_v52 }
  0x97   : > { %947 = vmatmul.msk.bf16.vlgmr.msra.gmra.mxu0 %vm205_vm1, %v174_v54  ;;  %948 = vmatmul.msk.bf16.vlgmr.msra.gmra.mxu1 %vm205_vm1, %v174_v54 }
  0x98   : > { %291 = vmatpush.bf16.msrb.mxu0 %v267_v45  ;;  %304 = vmatpush.bf16.msrb.mxu1 %v269_v49 }
  0x99   : > { %350 = vmatpush.bf16.msrb.mxu2 %v335_v53 }
  0x9a   : > { %949 = vmatmul.msk.bf16.vlgmr.msra.gmra.mxu2 %vm205_vm1, %v174_v54 }
  0x9b   : > { %v324_v56 = vpop.permute.xlu0 %323 }
  0x9c   : > { %v329_v57 = vsel %vm327_vm2, %v322_v41, %v324_v56  ;;  %v401_v58 = vpop.permute.xlu2 %400 }
  0x9d   : > { %v338_v59 = vsel %vm209_vm0, %v329_v57, 0  ;;  %v405_v60 = vsel %vm402_vm4, %v399_v55, %v401_v58 }
  0x9e   : > { %363 = vmatpush.bf16.msrb.mxu3 %v338_v59  ;;  %v416_v62 = vsel %vm209_vm0, %v405_v60, 0 }
  0xa1   : > { %954 = vmatmul.msk.bf16.vlgmr.msrb.gmra.mxu3 %vm205_vm1, %v175_v61 }
  0xa2   : > { %451 = vmatpush.bf16.msra.mxu3 %v416_v62 }
  0xa3   : > { %v326_v63 = vpop.permute.xlu0 %325 }
  0xa4   : > { %v330_v0 = vsel %vm327_vm2, %v324_v56, %v326_v63  ;;  %v397_v1 = vpop.permute.xlu1 %396  ;;  %v470_v2 = vpop.permute.xlu2 %469  ;;  %v180_v56 = vld [vmem:[%s1173_s1 + $0x1c] sm:$0xf]  ;;  %v181_v63 = vld [vmem:[%s1173_s1 + $0x20] sm:$0xf] }
  0xa5   : > { %v341_v3 = vsel %vm209_vm0, %v330_v0, 0  ;;  %v404_v4 = vsel %vm402_vm4, %v397_v1, %v399_v55 }
  0xa6   : > { %v413_v5 = vsel %vm209_vm0, %v404_v4, 0  ;;  %376 = vmatpush.bf16.msra.mxu0 %v341_v3 }
  0xa7   : > { %438 = vmatpush.bf16.msra.mxu2 %v413_v5  ;;  %951 = vmatmul.msk.bf16.vlgmr.msrb.gmra.mxu0 %vm205_vm1, %v173_v37  ;;  %v280_v0 = vpop.f32.mrf.mxu3 }
  0xa8   : > { %952 = vmatmul.msk.bf16.vlgmr.msrb.gmra.mxu1 %vm205_vm1, %v173_v37 }
  0xaa   : > { %953 = vmatmul.msk.bf16.vlgmr.msrb.gmra.mxu2 %vm205_vm1, %v175_v61 }
  0xac   : > { %v395_v6 = vpop.permute.xlu1 %394  ;;  %v547_v7 = vpop.permute.xlu2 %546 }
  0xad   : > { %v403_v8 = vsel %vm402_vm4, %v395_v6, %v397_v1  ;;  %v474_v9 = vpop.permute.xlu0 %473 }
  0xae   : > { %v410_v10 = vsel %vm209_vm0, %v403_v8, 0 }
  0xaf   : > { %425 = vmatpush.bf16.msra.mxu1 %v410_v10  ;;  %v282_v1 = vpop.f32.mrf.mxu3 }
  0xb1   : > { %958 = vmatmul.msk.bf16.vlgmr.msra.gmra.mxu3 %vm205_vm1, %v176_v11 }
  0xb4   : > { %v476_v12 = vpop.permute.xlu1 %475  ;;  %v549_v13 = vpop.permute.xlu2 %548 }
  0xb5   : > { %v480_v14 = vsel %vm477_vm5, %v474_v9, %v476_v12  ;;  %v472_v15 = vpop.permute.xlu0 %471  ;;  %v554_v16 = vsel %vm552_vm6, %v547_v7, %v549_v13 }
  0xb6   : > { %v491_v17 = vsel %vm209_vm0, %v480_v14, 0  ;;  %v479_v18 = vsel %vm477_vm5, %v472_v15, %v474_v9  ;;  %v478_v19 = vsel %vm477_vm5, %v470_v2, %v472_v15  ;;  %v563_v22 = vsel %vm209_vm0, %v554_v16, 0 }
  0xb7   : > { %v488_v20 = vsel %vm209_vm0, %v479_v18, 0  ;;  %v485_v21 = vsel %vm209_vm0, %v478_v19, 0  ;;  %526 = vmatpush.bf16.msrb.mxu2 %v491_v17  ;;  %955 = vmatmul.msk.bf16.vlgmr.msra.gmra.mxu0 %vm205_vm1, %v175_v61 }
  0xb8   : > { %513 = vmatpush.bf16.msrb.mxu1 %v488_v20  ;;  %500 = vmatpush.bf16.msrb.mxu0 %v485_v21 }
  0xb9   : > { %956 = vmatmul.msk.bf16.vlgmr.msra.gmra.mxu1 %vm205_vm1, %v176_v11 }
  0xba   : > { %957 = vmatmul.msk.bf16.vlgmr.msra.gmra.mxu2 %vm205_vm1, %v176_v11 }
  0xbc   : > { %588 = vmatpush.bf16.msra.mxu0 %v563_v22  ;;  %v545_v23 = vpop.permute.xlu1 %544  ;;  %v697_v24 = vpop.permute.xlu2 %696 }
  0xbd   : > { %v553_v25 = vsel %vm552_vm6, %v545_v23, %v547_v7 }
  0xbe   : > { %v560_v26 = vsel %vm209_vm0, %v553_v25, 0 }
  0xbf   : > { %v620_v27 = vpop.permute.xlu0 %619  ;;  %575 = vmatpush.bf16.msrb.mxu3 %v560_v26 }
  0xc2   : > { %962 = vmatmul.msk.bf16.vlgmr.msrb.gmra.mxu3 %vm205_vm1, %v178_v28 }
  0xc4   : > { %v622_v29 = vpop.permute.xlu1 %621  ;;  %v695_v31 = vpop.permute.xlu2 %694 }
  0xc5   : > { %v628_v32 = vsel %vm627_vm7, %v620_v27, %v622_v29  ;;  %v703_v33 = vsel %vm702_vm8, %v695_v31, %v697_v24 }
  0xc6   : > { %v635_v34 = vsel %vm209_vm0, %v628_v32, 0  ;;  %v710_v37 = vsel %vm209_vm0, %v703_v33, 0 }
  0xc7   : > { %650 = vmatpush.bf16.msra.mxu2 %v635_v34  ;;  %v551_v35 = vpop.permute.xlu0 %550  ;;  %959 = vmatmul.msk.bf16.vlgmr.msrb.gmra.mxu0 %vm205_vm1, %v177_v30 }
  0xc8   : > { %v555_v36 = vsel %vm552_vm6, %v549_v13, %v551_v35 }
  0xc9   : > { %v566_v38 = vsel %vm209_vm0, %v555_v36, 0  ;;  %960 = vmatmul.msk.bf16.vlgmr.msrb.gmra.mxu1 %vm205_vm1, %v177_v30 }
  0xca   : > { %961 = vmatmul.msk.bf16.vlgmr.msrb.gmra.mxu2 %vm205_vm1, %v177_v30  ;;  %601 = vmatpush.bf16.msra.mxu1 %v566_v38 }
  0xcc   : > { %v624_v39 = vpop.permute.xlu1 %623  ;;  %v776_v52 = vpop.permute.xlu2 %775 }
  0xcd   : > { %v629_v40 = vsel %vm627_vm7, %v622_v29, %v624_v39 }
  0xce   : > { %725 = vmatpush.bf16.msrb.mxu1 %v710_v37  ;;  %v638_v41 = vsel %vm209_vm0, %v629_v40, 0 }
  0xcf   : > { %663 = vmatpush.bf16.msra.mxu3 %v638_v41  ;;  %v699_v42 = vpop.permute.xlu0 %698 }
  0xd0   : > { %v704_v44 = vsel %vm702_vm8, %v697_v24, %v699_v42 }
  0xd1   : > { %v713_v45 = vsel %vm209_vm0, %v704_v44, 0 }
  0xd2   : > { %966 = vmatmul.msk.bf16.vlgmr.msra.gmra.mxu3 %vm205_vm1, %v179_v43  ;;  %738 = vmatpush.bf16.msrb.mxu2 %v713_v45 }
  0xd4   : > { %v626_v46 = vpop.permute.xlu1 %625 }
  0xd5   : > { %v630_v47 = vsel %vm627_vm7, %v624_v39, %v626_v46 }
  0xd6   : > { %v641_v48 = vsel %vm209_vm0, %v630_v47, 0 }
  0xd7   : > { %676 = vmatpush.bf16.msrb.mxu0 %v641_v48  ;;  %v701_v49 = vpop.permute.xlu0 %700 }
  0xd8   : > { %v705_v50 = vsel %vm702_vm8, %v699_v42, %v701_v49  ;;  %963 = vmatmul.msk.bf16.vlgmr.msra.gmra.mxu0 %vm205_vm1, %v178_v28 }
  0xd9   : > { %v716_v51 = vsel %vm209_vm0, %v705_v50, 0  ;;  %964 = vmatmul.msk.bf16.vlgmr.msra.gmra.mxu1 %vm205_vm1, %v178_v28 }
  0xda   : > { %965 = vmatmul.msk.bf16.vlgmr.msra.gmra.mxu2 %vm205_vm1, %v179_v43  ;;  %751 = vmatpush.bf16.msrb.mxu3 %v716_v51 }
  0xdc   : > { %v774_v53 = vpop.permute.xlu1 %773 }
  0xdd   : > { %v780_v54 = vsel %vm777_vm9, %v774_v53, %v776_v52 }
  0xde   : > { %v791_v55 = vsel %vm209_vm0, %v780_v54, 0 }
  0xdf   : > { %826 = vmatpush.bf16.msra.mxu2 %v791_v55  ;;  %v770_v57 = vpop.permute.xlu0 %769 }
  0xe2   : > { %970 = vmatmul.msk.bf16.vlgmr.msrb.gmra.mxu3 %vm205_vm1, %v180_v56 }
  0xe4   : > { %v772_v58 = vpop.permute.xlu1 %771 }
  0xe5   : > { %v779_v59 = vsel %vm777_vm9, %v772_v58, %v774_v53  ;;  %v778_v60 = vsel %vm777_vm9, %v770_v57, %v772_v58 }
  0xe6   : > { %v788_v61 = vsel %vm209_vm0, %v779_v59, 0  ;;  %v785_v62 = vsel %vm209_vm0, %v778_v60, 0  ;;  %v172_v60 = vld [vmem:[%s1174_s2] sm:$0x7] }
  0xe7   : > { %813 = vmatpush.bf16.msra.mxu1 %v788_v61  ;;  %800 = vmatpush.bf16.msra.mxu0 %v785_v62 }
  0xe8   : > { %967 = vmatmul.msk.bf16.vlgmr.msrb.gmra.mxu0 %vm205_vm1, %v179_v43 }
  0xe9   : > { %968 = vmatmul.msk.bf16.vlgmr.msrb.gmra.mxu1 %vm205_vm1, %v180_v56 }
  0xea   : > { %969 = vmatmul.msk.bf16.vlgmr.msrb.gmra.mxu2 %vm205_vm1, %v180_v56 }
  0xf8   : > { %971 = vmatmul.msk.bf16.vlgmr.msra.gmra.mxu0 %vm205_vm1, %v181_v63 }
  0xf9   : > { %972 = vmatmul.msk.bf16.vlgmr.msra.gmra.mxu1 %vm205_vm1, %v181_v63 }
  0xfa   : > { %973 = vmatmul.msk.bf16.vlgmr.msra.gmra.mxu2 %vm205_vm1, %v181_v63 }
 0x114   : > { %v228_v2 = vpop.f32.mrf.mxu0  ;;  %v241_v3 = vpop.f32.mrf.mxu1 }
 0x115   : > { %v281_v4 = vadd.f32 %v280_v0, %v228_v2 }
 0x11c   : > { %v230_v6 = vpop.f32.mrf.mxu0  ;;  %v243_v7 = vpop.f32.mrf.mxu1 }
 0x11d   : > { %v254_v5 = vpop.f32.mrf.mxu2  ;;  %v837_v6 = vperm.slane %v172_v60, 1 }
 0x124   : > { %v293_v9 = vpop.f32.mrf.mxu0  ;;  %v365_v10 = vpop.f32.mrf.mxu3 }
 0x125   : > { %v256_v8 = vpop.f32.mrf.mxu2  ;;  %v294_v11 = vadd.f32 %v293_v9, %v241_v3  ;;  %v306_v12 = vpop.f32.mrf.mxu1  ;;  %v836_v3 = vperm.slane %v172_v60, 0 }
 0x126   : > { %v307_v13 = vadd.f32 %v306_v12, %v254_v5 }
 0x127   : > { %v383_v14 = vadd.f32 %v365_v10, %v294_v11 }
 0x12c   : > { %v295_v17 = vpop.f32.mrf.mxu0  ;;  %v367_v18 = vpop.f32.mrf.mxu3 }
 0x12d   : > { %v352_v15 = vpop.f32.mrf.mxu2  ;;  %v308_v19 = vpop.f32.mrf.mxu1 }
 0x12e   : > { %v382_v16 = vadd.f32 %v352_v15, %v281_v4 }
 0x134   : > { %v378_v21 = vpop.f32.mrf.mxu0  ;;  %v453_v22 = vpop.f32.mrf.mxu3 }
 0x135   : > { %v354_v20 = vpop.f32.mrf.mxu2  ;;  %v384_v51 = vadd.f32 %v378_v21, %v307_v13 }
 0x136   : > { %v427_v23 = vpop.f32.mrf.mxu1 }
 0x137   : > { %v457_v48 = vadd.f32 %v427_v23, %v382_v16  ;;  %v459_v58 = vadd.f32 %v453_v22, %v384_v51 }
 0x13c   : > { %v380_v25 = vpop.f32.mrf.mxu0  ;;  %v455_v26 = vpop.f32.mrf.mxu3 }
 0x13d   : > { %v440_v24 = vpop.f32.mrf.mxu2 }
 0x13e   : > { %v429_v27 = vpop.f32.mrf.mxu1  ;;  %v458_v49 = vadd.f32 %v440_v24, %v383_v14  ;;  %v838_v14 = vperm.slane %v172_v60, 2 }
 0x144   : > { %v502_v29 = vpop.f32.mrf.mxu0 }
 0x145   : > { %v442_v28 = vpop.f32.mrf.mxu2  ;;  %v577_v30 = vpop.f32.mrf.mxu3  ;;  %v532_v52 = vadd.f32 %v502_v29, %v457_v48 }
 0x146   : > { %v515_v31 = vpop.f32.mrf.mxu1 }
 0x147   : > { %v533_v53 = vadd.f32 %v515_v31, %v458_v49  ;;  %v607_v59 = vadd.f32 %v577_v30, %v532_v52 }
 0x14c   : > { %v504_v33 = vpop.f32.mrf.mxu0 }
 0x14d   : > { %v528_v32 = vpop.f32.mrf.mxu2  ;;  %v579_v34 = vpop.f32.mrf.mxu3 }
 0x14e   : > { %v517_v35 = vpop.f32.mrf.mxu1  ;;  %v534_v61 = vadd.f32 %v528_v32, %v459_v58 }
 0x155   : > { %v530_v36 = vpop.f32.mrf.mxu2  ;;  %v590_v37 = vpop.f32.mrf.mxu0 }
 0x156   : > { %v665_v38 = vpop.f32.mrf.mxu3  ;;  %v603_v39 = vpop.f32.mrf.mxu1  ;;  %v608_v57 = vadd.f32 %v590_v37, %v533_v53 }
 0x157   : > { %v609_v1 = vadd.f32 %v603_v39, %v534_v61 }
 0x158   : > { %v683_v63 = vadd.f32 %v665_v38, %v608_v57 }
 0x15d   : > { %v652_v40 = vpop.f32.mrf.mxu2  ;;  %v592_v41 = vpop.f32.mrf.mxu0 }
 0x15e   : > { %v667_v42 = vpop.f32.mrf.mxu3  ;;  %v605_v43 = vpop.f32.mrf.mxu1  ;;  %v682_v62 = vadd.f32 %v652_v40, %v607_v59 }
 0x165   : > { %v654_v44 = vpop.f32.mrf.mxu2  ;;  %v678_v45 = vpop.f32.mrf.mxu0 }
 0x166   : > { %v753_v46 = vpop.f32.mrf.mxu3  ;;  %v727_v47 = vpop.f32.mrf.mxu1  ;;  %v684_v7 = vadd.f32 %v678_v45, %v609_v1 }
 0x167   : > { %v757_v2 = vadd.f32 %v727_v47, %v682_v62 }
 0x168   : > { %v759_v13 = vadd.f32 %v753_v46, %v684_v7 }
 0x16d   : > { %v740_v50 = vpop.f32.mrf.mxu2  ;;  %v680_v54 = vpop.f32.mrf.mxu0 }
 0x16e   : > { %v755_v55 = vpop.f32.mrf.mxu3  ;;  %v729_v56 = vpop.f32.mrf.mxu1  ;;  %v758_v4 = vadd.f32 %v740_v50, %v683_v63 }
 0x175   : > { %v742_v0 = vpop.f32.mrf.mxu2  ;;  %v802_v5 = vpop.f32.mrf.mxu0 }
 0x176   : > { %v832_v8 = vadd.f32 %v802_v5, %v757_v2  ;;  %v815_v9 = vpop.f32.mrf.mxu1 }
 0x177   : > { %v833_v10 = vadd.f32 %v815_v9, %v758_v4 }
 0x178   : > { %v842_v11 = vmul.f32 %v836_v3, %v832_v8 }
 0x179   : > { %v843_v12 = vmul.f32 %v837_v6, %v833_v10 }
 0x17a   : > { %v849_v17 = vmul.f32 %v842_v11, %v842_v11 }
 0x17b   : > { %v850_v18 = vmul.f32 %v843_v12, %v843_v12  ;;  %v845_v22 = vadd.f32 %v843_v12, %v842_v11 }
 0x17d   : > { %v828_v15 = vpop.f32.mrf.mxu2  ;;  %v804_v19 = vpop.f32.mrf.mxu0  ;;  %v852_v25 = vadd.f32 %v850_v18, %v849_v17 }
 0x17e   : > { %v834_v16 = vadd.f32 %v828_v15, %v759_v13  ;;  %v817_v21 = vpop.f32.mrf.mxu1 }
 0x180   : > { %v844_v20 = vmul.f32 %v838_v14, %v834_v16 }
 0x182   : > { %v846_v23 = vadd.f32 %v845_v22, %v844_v20  ;;  %v851_v24 = vmul.f32 %v844_v20, %v844_v20 }
 0x184   : > { %847 = vadd.xlane.f32.xlu2 %v846_v23  ;;  %v853_v26 = vadd.f32 %v852_v25, %v851_v24 }
 0x185   : > { %v830_v27 = vpop.f32.mrf.mxu2 }
 0x186   : > { %854 = vadd.xlane.f32.xlu0 %v853_v26 }
 0x1f7   : > { %v848_v28 = vpop.xlane.xlu2 %847 }
 0x1f8   : > { %v856_v29 = vmul.f32 0.00390625, %v848_v28 }
 0x1f9   : > { %v855_v30 = vpop.xlane.xlu0 %854 }
 0x1fa   : > { %v857_v31 = vmul.f32 0.00390625, %v855_v30  ;;  %v858_v32 = vmul.f32 %v856_v29, %v856_v29  ;;  %v860_v41 = vsub.f32 %v842_v11, %v856_v29  ;;  %v861_v42 = vsub.f32 %v843_v12, %v856_v29 }
 0x1fb   : > { %v862_v43 = vsub.f32 %v844_v20, %v856_v29 }
 0x1fc   : > { %v859_v33 = vsub.f32 %v857_v31, %v858_v32 }
 0x1fe   : > { %v863_v34 = vadd.f32 1e-05, %v859_v33 }
 0x200   : > { %994 = vrsqrt.f32 %v863_v34  ;;  %vm870_vm11 = vweird.f32 %v863_v34 }
 0x206   : > { %v995_v35 = vpop.eup %994 }
 0x207   : > { %v865_v36 = vmul.f32 %v995_v35, %v863_v34  ;;  %vm871_vm10 = vweird.f32 %v995_v35 }
 0x208   : > { %vm872_vm12 = vmor %vm870_vm11, %vm871_vm10 }
 0x209   : > { %v866_v37 = vmul.f32 %v995_v35, %v865_v36 }
 0x20b   : > { %v867_v38 = vmul.f32 0.5, %v866_v37 }
 0x20d   : > { %v868_v39 = vsub.f32 1.5, %v867_v38 }
 0x20f   : > { %v869_v40 = vmul.f32 %v995_v35, %v868_v39 }
 0x211   : > { %v873_v44 = vsel %vm872_vm12, %v995_v35, %v869_v40 }
 0x212   : > { %v874_v45 = vmul.f32 %v873_v44, %v860_v41  ;;  %v875_v46 = vmul.f32 %v873_v44, %v861_v42  ;;  %v876_v47 = vmul.f32 %v873_v44, %v862_v43 }
 0x214   : > { %v877_v48 = vmax.f32 %v874_v45, 0.0  ;;  %v878_v49 = vmax.f32 %v875_v46, 0.0  ;;  %v879_v50 = vmax.f32 %v876_v47, 0.0 }
 0x216   : > { %v880_v51 = vpack.c.bf16 %v878_v49, %v877_v48  ;;  %v881_v52 = vpack.c.bf16 %v879_v50, %v879_v50 }
 0x218   : > { %882 = vst [vmem:[%s170_s24] sm:$0xff] %v880_v51 }
 0x219   : > { %883 = vst [vmem:[%s170_s24 + $0x8] sm:$0xf] %v881_v52 }
 0x21a PF: > { %s13_s12 = sadd.s32 1, %s1002_s12  }
 0x21b   : > { %p10_p4 = scmp.ge.s32.totalorder %s13_s12, 4  }
 0x21d   :  { %12 = sbr.rel (!%p10_p4) target bundleno = 1 (0x1), region = 62 }

</bundles_post_ra>
